<compile_context>
chip_gen: v5e
topology: v5e:2x2
jax: 0.10.0
libtpu: 0.0.40
codegen_flags: <defaults>
</compile_context>

<pallas_src>
import jax
import jax.numpy as jnp
from jax import lax
from jax.experimental import pallas as pl
from jax.experimental.pallas import tpu as pltpu

# ---- static configuration (mirrors the nn.Module constructor / class attrs) --------
N = 16            # nodes per graph
F_IN = 8          # in_dim
F_OUT = 8         # out_dim (== in_dim so residual=True is legal)
K = 3             # Chebyshev order k
E = 8             # ChebAugmentedLayer.num_eigs
E2 = E * E
BN_EPS = 1e-5
RESIDUAL = True
PACK_W = N + F_IN + E2 + N            # [L_hat | feat | tiled evecs | padded evecs^T]
GRAPHS_PER_BLOCK = 2                  # >=2 grid steps keeps both v7x TensorCores busy;
                                      # set to B on v5e/v6e to collapse the grid to one step.


# -------------------------------------------------------------------------------------
# Fused kernel: one grid step == GRAPHS_PER_BLOCK independent graph forwards.
# -------------------------------------------------------------------------------------
def _cheb_aug_kernel(pack_ref, s0_ref, sw_ref, sb_ref, r_ref,
                     lw_ref, lb_ref, gamma_ref, beta_ref, out_ref):
    lhat = pack_ref[:, :, 0:N]                         # (Bt, N, N)   pre-scaled Laplacian
    feat = pack_ref[:, :, N:N + F_IN]                  # (Bt, N, F_IN)
    eexp = pack_ref[:, :, N + F_IN:N + F_IN + E2]      # (Bt, N, E2)  evecs tiled E times
    evT = pack_ref[:, 0:E, N + F_IN + E2:PACK_W]       # (Bt, E, N)   evecs^T (zero-pad rows dropped)

    def bmm(a, b):  # (Bt, M, Kc) @ (Bt, Kc, Nc) -> (Bt, M, Nc), batch over graphs
        return lax.dot_general(a, b, (((2,), (1,)), ((0,), (0,))),
                               preferred_element_type=jnp.float32)

    # ---- Chebyshev spatial recursion: X1 = L_hat X0 ; Xi = 2 L_hat X_{i-1} - X_{i-2} ----
    blocks = [feat]
    if K > 1:
        x1 = bmm(lhat, feat)
        blocks.append(x1)
        x0 = feat
        for _ in range(2, K):
            xi = 2.0 * bmm(lhat, x1) - x0
            blocks.append(xi)
            x0, x1 = x1, xi

    # ---- batched spectral-filter recursion (flat): s (Bt, E2) @ W (E2, E2) ----
    s = s0_ref[...]                                    # (Bt, E2) = flat diag(evals)
    for n in range(K):                                 # K static -> unrolled
        s = jnp.dot(s, sw_ref[n], preferred_element_type=jnp.float32) + sb_ref[n]
        if n < K - 1:
            # TODO(synk): `spectral_activation` is not defined in the provided module
            # source; ReLU is used as the spectral activation here.
            s = jnp.maximum(s, 0.0)

    # ---- spectral augmentation without any (Bt,E2)->(Bt,E,E) relayout:
    #      M[z,e] = sum_i evecs[z,i] s[e,i] = ((tile(evecs) * s_flat) @ R)[z,e]
    #      spec   = M @ (evecs^T @ feat)
    tmp = eexp * s[:, None, :]                         # (Bt, N, E2)
    m_mat = jnp.dot(tmp.reshape(-1, E2), r_ref[...],
                    preferred_element_type=jnp.float32).reshape(-1, N, E)   # (Bt, N, E)
    g = bmm(evT, feat)                                 # (Bt, E, F_IN) = evecs^T @ feat
    spec = bmm(m_mat, g)                               # (Bt, N, F_IN)
    blocks.append(spec)

    # ---- Linear over concat(blocks): single (Bt*N,(K+1)F) @ ((K+1)F,F_OUT) matmul ----
    xt = jnp.concatenate(blocks, axis=2).reshape(-1, (K + 1) * F_IN)
    h = jnp.dot(xt, lw_ref[...], preferred_element_type=jnp.float32) + lb_ref[...]
    h = h.reshape(-1, N, F_OUT)                        # (Bt, N, F_OUT)

    # ---- BatchNorm1d (training-mode batch statistics, per graph over its N nodes) ----
    # TODO(synk): running_mean/var updates and batched-dgl (all-nodes) BN stats not modeled.
    mu = jnp.mean(h, axis=1, keepdims=True)
    var = jnp.mean((h - mu) ** 2, axis=1, keepdims=True)
    h = (h - mu) * lax.rsqrt(var + BN_EPS) * gamma_ref[...] + beta_ref[...]

    # ---- activation (ReLU), residual, dropout(p=0)=identity ----
    h = jnp.maximum(h, 0.0)
    if RESIDUAL:
        h = feat + h
    out_ref[...] = h


# -------------------------------------------------------------------------------------
# Glue: per-graph eigendecomposition / lambda_max (cached once in the PyTorch module).
# -------------------------------------------------------------------------------------
def graph_preprocess(adj):
    adj = adj.astype(jnp.float32)
    n = adj.shape[0]
    deg = adj.sum(axis=1)

    # normalized_laplacian is falsy in the module -> unnormalized Laplacian for eigenpairs.
    lap = jnp.diag(deg) - adj
    evals, evecs = jnp.linalg.eigh(lap)                # ascending == module's argsort of torch.eig
    evals = evals[:E]
    evecs = evecs[:, :E]

    d_is = jnp.clip(deg, 1.0, None) ** -0.5            # in_degrees.clamp(1) ** -0.5
    adj_hat = d_is[:, None] * adj * d_is[None, :]
    lambda_max = jnp.linalg.eigvalsh(jnp.eye(n, dtype=jnp.float32) - adj_hat)[-1]
    renorm = 2.0 / lambda_max
    l_hat = renorm * (jnp.eye(n, dtype=jnp.float32) - adj_hat) - jnp.eye(n, dtype=jnp.float32)

    return {
        "l_hat": l_hat.astype(jnp.float32),            # (N, N) pre-scaled Chebyshev operator
        "evals": evals.astype(jnp.float32),            # (E,)
        "evecs": evecs.astype(jnp.float32),            # (N, E)
        "s0": jnp.diag(evals).reshape(E2).astype(jnp.float32),   # flat diag(evals)
        "renorm": renorm.astype(jnp.float32),
        "d_is": d_is.astype(jnp.float32),
    }


# -------------------------------------------------------------------------------------
# Wrapper: one fused pallas_call, GRAPHS_PER_BLOCK graphs per grid step.
# -------------------------------------------------------------------------------------
def cheb_augmented_forward(feat_b, params, pre_b, graphs_per_block=GRAPHS_PER_BLOCK):
    B = feat_b.shape[0]
    bt = min(graphs_per_block, B)
    assert B % bt == 0, "batch must be divisible by graphs_per_block"
    steps = B // bt
    feat_b = feat_b.astype(jnp.float32)

    # ---- host-side consolidation: one packed per-graph array, one DMA per step ----
    evecs = pre_b["evecs"]                                            # (B, N, E)
    eexp = jnp.tile(evecs, (1, 1, E))                                 # (B, N, E2)
    evt_pad = jnp.concatenate(
        [jnp.swapaxes(evecs, 1, 2),
         jnp.zeros((B, N - E, N), jnp.float32)], axis=1)              # (B, N, N)
    pack = jnp.concatenate([pre_b["l_hat"], feat_b, eexp, evt_pad], axis=2)  # (B, N, PACK_W)

    s0 = pre_b["s0"].reshape(steps, bt, E2)                           # (steps, bt, E2)

    # spectral weights flattened once: rows index (i,j), cols index (k,l)
    sw = params["spec_w"].reshape(K, E2, E2)
    sb = params["spec_b"].reshape(K, 1, E2)
    # constant block-selector R[m, e] = [m // E == e]
    r_mat = jnp.repeat(jnp.eye(E, dtype=jnp.float32), E, axis=0)      # (E2, E)

    in_specs = [
        pl.BlockSpec((bt, N, PACK_W), lambda i: (i, 0, 0)),           # packed per-graph data
        pl.BlockSpec((None, bt, E2), lambda i: (i, 0, 0)),            # s0 (flat diag(evals))
        pl.BlockSpec((K, E2, E2), lambda i: (0, 0, 0)),               # spectral W (shared)
        pl.BlockSpec((K, 1, E2), lambda i: (0, 0, 0)),                # spectral b (shared)
        pl.BlockSpec((E2, E), lambda i: (0, 0)),                      # R (shared constant)
        pl.BlockSpec(((K + 1) * F_IN, F_OUT), lambda i: (0, 0)),      # linear W
        pl.BlockSpec((1, F_OUT), lambda i: (0, 0)),                   # linear b
        pl.BlockSpec((1, F_OUT), lambda i: (0, 0)),                   # bn gamma
        pl.BlockSpec((1, F_OUT), lambda i: (0, 0)),                   # bn beta
    ]
    out = pl.pallas_call(
        _cheb_aug_kernel,
        grid=(steps,),
        in_specs=in_specs,
        out_specs=pl.BlockSpec((bt, N, F_OUT), lambda i: (i, 0, 0)),
        out_shape=jax.ShapeDtypeStruct((B, N, F_OUT), jnp.float32),
        compiler_params=pltpu.CompilerParams(dimension_semantics=("parallel",)),
    )(pack, s0, sw, sb, r_mat,
      params["lin_w"], params["lin_b"], params["bn_gamma"], params["bn_beta"])
    return out


# -------------------------------------------------------------------------------------
# Pure-JAX reference (mirrors the PyTorch forward) for validation.
# -------------------------------------------------------------------------------------
def reference_forward_single(adj, feat, params, pre):
    adj = adj.astype(jnp.float32)
    feat = feat.astype(jnp.float32)
    rn = pre["renorm"]
    d_is = pre["d_is"][:, None]
    evals, evecs = pre["evals"], pre["evecs"]

    def unnlap(x):
        return d_is * (adj @ (d_is * x))

    Xt = x0 = feat
    if K > 1:
        h = unnlap(x0)
        x1 = -rn * h + x0 * (rn - 1.0)
        Xt = jnp.concatenate([Xt, x1], axis=1)
        for _ in range(2, K):
            h = unnlap(x1)
            xi = -2.0 * rn * h + x1 * 2.0 * (rn - 1.0) - x0
            Xt = jnp.concatenate([Xt, xi], axis=1)
            x0, x1 = x1, xi

    s = jnp.diag(evals)
    for n in range(K):
        s = jnp.einsum("ijkl,ij->kl", params["spec_w"][n], s) + params["spec_b"][n]
        if n < K - 1:
            s = jnp.maximum(s, 0.0)
    spec = jnp.einsum("zi,ei,ne,nf->zf", evecs, s, evecs, feat)
    Xt = jnp.concatenate([Xt, spec], axis=1)

    h = Xt @ params["lin_w"] + params["lin_b"]
    mu = h.mean(axis=0, keepdims=True)
    var = ((h - mu) ** 2).mean(axis=0, keepdims=True)
    h = (h - mu) / jnp.sqrt(var + BN_EPS) * params["bn_gamma"] + params["bn_beta"]
    h = jnp.maximum(h, 0.0)
    if RESIDUAL:
        h = feat + h
    return h


if __name__ == "__main__":
    key = jax.random.PRNGKey(0)
    B = 4   # batch of independent single-graph layer invocations

    # deterministic small undirected graphs: 16-ring plus a chord at varying offsets
    idx = jnp.arange(N)
    adjs = []
    for off in (2, 3, 5, 7):
        a = jnp.zeros((N, N), jnp.float32)
        a = a.at[idx, (idx + 1) % N].set(1.0)
        a = a.at[(idx + 1) % N, idx].set(1.0)
        a = a.at[idx, (idx + off) % N].set(1.0)
        a = a.at[(idx + off) % N, idx].set(1.0)
        adjs.append(a)
    adj_b = jnp.stack(adjs)                                         # (B, N, N)

    k_feat, k_w, k_b, k_lw, k_lb = jax.random.split(key, 5)
    feat_b = jax.random.normal(k_feat, (B, N, F_IN), jnp.float32)   # (B, N, F_IN)

    params = {
        # subtype='dense': k tensors of shape (num_eigs,)*4 and biases (num_eigs,)*2
        "spec_w": 0.1 * jax.random.normal(k_w, (K, E, E, E, E), jnp.float32),
        "spec_b": 0.05 * jax.random.normal(k_b, (K, E, E), jnp.float32),
        # nn.Linear((k+1)*in_dim, out_dim) — stored already transposed (in, out)
        "lin_w": 0.1 * jax.random.normal(k_lw, ((K + 1) * F_IN, F_OUT), jnp.float32),
        "lin_b": 0.01 * jax.random.normal(k_lb, (F_OUT,), jnp.float32).reshape(1, F_OUT),
        # BatchNorm1d default affine init
        "bn_gamma": jnp.ones((1, F_OUT), jnp.float32),
        "bn_beta": jnp.zeros((1, F_OUT), jnp.float32),
    }

    pres = [graph_preprocess(adj_b[b]) for b in range(B)]
    pre_b = {k_: jnp.stack([p[k_] for p in pres]) for k_ in pres[0]}

    out = cheb_augmented_forward(feat_b, params, pre_b)
    jax.block_until_ready(out)

    ref = jnp.stack([
        reference_forward_single(adj_b[b], feat_b[b], params,
                                 {k_: pre_b[k_][b] for k_ in pre_b})
        for b in range(B)
    ])
    err = float(jnp.max(jnp.abs(out - ref)))
    assert jnp.allclose(out, ref, rtol=2e-3, atol=2e-3), f"max abs err {err}"

    print("KERNEL_OK")
</pallas_src>

<mosaic_0001>
module attributes {stable_mosaic.version = 11 : i64} {
  func.func @_cheb_aug_kernel(%arg0: i32, %arg1: memref<2x16x104xf32, #tpu.memory_space<vmem>>, %arg2: memref<1x2x64xf32, #tpu.memory_space<vmem>>, %arg3: memref<3x64x64xf32, #tpu.memory_space<vmem>>, %arg4: memref<3x1x64xf32, #tpu.memory_space<vmem>>, %arg5: memref<64x8xf32, #tpu.memory_space<vmem>>, %arg6: memref<32x8xf32, #tpu.memory_space<vmem>>, %arg7: memref<1x8xf32, #tpu.memory_space<vmem>>, %arg8: memref<1x8xf32, #tpu.memory_space<vmem>>, %arg9: memref<1x8xf32, #tpu.memory_space<vmem>>, %arg10: memref<2x16x8xf32, #tpu.memory_space<vmem>>) attributes {dimension_semantics = [#tpu.dimension_semantics<parallel>], iteration_bounds = array<i64: 2>, scalar_prefetch = 0 : i64, scratch_operands = 0 : i64, tpu.core_type = #tpu.core_type<tc>, window_params = [{transform_indices = @transform_0, window_bounds = array<i64: 2, 16, 104>}, {transform_indices = @transform_1, window_bounds = array<i64: 1, 2, 64>}, {pipeline_mode = #tpu.pipeline_mode<synchronous>, transform_indices = @transform_2, window_bounds = array<i64: 3, 64, 64>}, {pipeline_mode = #tpu.pipeline_mode<synchronous>, transform_indices = @transform_3, window_bounds = array<i64: 3, 1, 64>}, {pipeline_mode = #tpu.pipeline_mode<synchronous>, transform_indices = @transform_4, window_bounds = array<i64: 64, 8>}, {pipeline_mode = #tpu.pipeline_mode<synchronous>, transform_indices = @transform_5, window_bounds = array<i64: 32, 8>}, {pipeline_mode = #tpu.pipeline_mode<synchronous>, transform_indices = @transform_6, window_bounds = array<i64: 1, 8>}, {pipeline_mode = #tpu.pipeline_mode<synchronous>, transform_indices = @transform_7, window_bounds = array<i64: 1, 8>}, {pipeline_mode = #tpu.pipeline_mode<synchronous>, transform_indices = @transform_8, window_bounds = array<i64: 1, 8>}, {transform_indices = @transform_9, window_bounds = array<i64: 2, 16, 8>}]} {
    %c0 = arith.constant 0 : index
    %c0_0 = arith.constant 0 : index
    %c0_1 = arith.constant 0 : index
    %0 = vector.load %arg1[%c0, %c0_0, %c0_1] : memref<2x16x104xf32, #tpu.memory_space<vmem>>, vector<2x16x16xf32>
    %c0_2 = arith.constant 0 : index
    %c0_3 = arith.constant 0 : index
    %c16 = arith.constant 16 : index
    %1 = vector.load %arg1[%c0_2, %c0_3, %c16] : memref<2x16x104xf32, #tpu.memory_space<vmem>>, vector<2x16x8xf32>
    %c0_4 = arith.constant 0 : index
    %c0_5 = arith.constant 0 : index
    %c24 = arith.constant 24 : index
    %2 = vector.load %arg1[%c0_4, %c0_5, %c24] : memref<2x16x104xf32, #tpu.memory_space<vmem>>, vector<2x16x64xf32>
    %c0_6 = arith.constant 0 : index
    %c0_7 = arith.constant 0 : index
    %c88 = arith.constant 88 : index
    %3 = vector.load %arg1[%c0_6, %c0_7, %c88] : memref<2x16x104xf32, #tpu.memory_space<vmem>>, vector<2x8x16xf32>
    %cst = arith.constant dense<0.000000e+00> : vector<2x16x8xf32>
    %4 = tpu.matmul %0, %1, %cst {dimension_numbers = #tpu.dot_dimension_numbers<[2], [1], [1], [2], [0, 0, 0, 1, 1, 2], [0], [0]>} : vector<2x16x16xf32>, vector<2x16x8xf32>, vector<2x16x8xf32> -> vector<2x16x8xf32>
    %cst_8 = arith.constant dense<0.000000e+00> : vector<2x16x8xf32>
    %5 = tpu.matmul %0, %4, %cst_8 {dimension_numbers = #tpu.dot_dimension_numbers<[2], [1], [1], [2], [0, 0, 0, 1, 1, 2], [0], [0]>} : vector<2x16x16xf32>, vector<2x16x8xf32>, vector<2x16x8xf32> -> vector<2x16x8xf32>
    %cst_9 = arith.constant 2.000000e+00 : f32
    %6 = vector.broadcast %cst_9 : f32 to vector<2x16x8xf32>
    %7 = arith.mulf %6, %5 : vector<2x16x8xf32>
    %8 = arith.subf %7, %1 : vector<2x16x8xf32>
    %c0_10 = arith.constant 0 : index
    %c0_11 = arith.constant 0 : index
    %c0_12 = arith.constant 0 : index
    %9 = vector.load %arg2[%c0_10, %c0_11, %c0_12] : memref<1x2x64xf32, #tpu.memory_space<vmem>>, vector<1x2x64xf32>
    %10 = vector.shape_cast %9 : vector<1x2x64xf32> to vector<2x64xf32>
    %c0_13 = arith.constant 0 : index
    %c0_14 = arith.constant 0 : index
    %c0_15 = arith.constant 0 : index
    %11 = vector.load %arg3[%c0_13, %c0_14, %c0_15] : memref<3x64x64xf32, #tpu.memory_space<vmem>>, vector<1x64x64xf32>
    %12 = vector.shape_cast %11 : vector<1x64x64xf32> to vector<64x64xf32>
    %cst_16 = arith.constant dense<0.000000e+00> : vector<2x64xf32>
    %13 = tpu.matmul %10, %12, %cst_16 {dimension_numbers = #tpu.dot_dimension_numbers<[1], [0], [0], [1], [0, 0, 1, 1], [], []>} : vector<2x64xf32>, vector<64x64xf32>, vector<2x64xf32> -> vector<2x64xf32>
    %c0_17 = arith.constant 0 : index
    %c0_18 = arith.constant 0 : index
    %c0_19 = arith.constant 0 : index
    %14 = vector.load %arg4[%c0_17, %c0_18, %c0_19] : memref<3x1x64xf32, #tpu.memory_space<vmem>>, vector<1x1x64xf32>
    %15 = vector.shape_cast %14 : vector<1x1x64xf32> to vector<1x64xf32>
    %16 = vector.broadcast %15 : vector<1x64xf32> to vector<2x64xf32>
    %17 = arith.addf %13, %16 : vector<2x64xf32>
    %cst_20 = arith.constant 0.000000e+00 : f32
    %18 = vector.broadcast %cst_20 : f32 to vector<2x64xf32>
    %19 = arith.maximumf %17, %18 : vector<2x64xf32>
    %c1 = arith.constant 1 : index
    %c0_21 = arith.constant 0 : index
    %c0_22 = arith.constant 0 : index
    %20 = vector.load %arg3[%c1, %c0_21, %c0_22] : memref<3x64x64xf32, #tpu.memory_space<vmem>>, vector<1x64x64xf32>
    %21 = vector.shape_cast %20 : vector<1x64x64xf32> to vector<64x64xf32>
    %cst_23 = arith.constant dense<0.000000e+00> : vector<2x64xf32>
    %22 = tpu.matmul %19, %21, %cst_23 {dimension_numbers = #tpu.dot_dimension_numbers<[1], [0], [0], [1], [0, 0, 1, 1], [], []>} : vector<2x64xf32>, vector<64x64xf32>, vector<2x64xf32> -> vector<2x64xf32>
    %c1_24 = arith.constant 1 : index
    %c0_25 = arith.constant 0 : index
    %c0_26 = arith.constant 0 : index
    %23 = vector.load %arg4[%c1_24, %c0_25, %c0_26] : memref<3x1x64xf32, #tpu.memory_space<vmem>>, vector<1x1x64xf32>
    %24 = vector.shape_cast %23 : vector<1x1x64xf32> to vector<1x64xf32>
    %25 = vector.broadcast %24 : vector<1x64xf32> to vector<2x64xf32>
    %26 = arith.addf %22, %25 : vector<2x64xf32>
    %cst_27 = arith.constant 0.000000e+00 : f32
    %27 = vector.broadcast %cst_27 : f32 to vector<2x64xf32>
    %28 = arith.maximumf %26, %27 : vector<2x64xf32>
    %c2 = arith.constant 2 : index
    %c0_28 = arith.constant 0 : index
    %c0_29 = arith.constant 0 : index
    %29 = vector.load %arg3[%c2, %c0_28, %c0_29] : memref<3x64x64xf32, #tpu.memory_space<vmem>>, vector<1x64x64xf32>
    %30 = vector.shape_cast %29 : vector<1x64x64xf32> to vector<64x64xf32>
    %cst_30 = arith.constant dense<0.000000e+00> : vector<2x64xf32>
    %31 = tpu.matmul %28, %30, %cst_30 {dimension_numbers = #tpu.dot_dimension_numbers<[1], [0], [0], [1], [0, 0, 1, 1], [], []>} : vector<2x64xf32>, vector<64x64xf32>, vector<2x64xf32> -> vector<2x64xf32>
    %c2_31 = arith.constant 2 : index
    %c0_32 = arith.constant 0 : index
    %c0_33 = arith.constant 0 : index
    %32 = vector.load %arg4[%c2_31, %c0_32, %c0_33] : memref<3x1x64xf32, #tpu.memory_space<vmem>>, vector<1x1x64xf32>
    %33 = vector.shape_cast %32 : vector<1x1x64xf32> to vector<1x64xf32>
    %34 = vector.broadcast %33 : vector<1x64xf32> to vector<2x64xf32>
    %35 = arith.addf %31, %34 : vector<2x64xf32>
    %36 = vector.shape_cast %35 : vector<2x64xf32> to vector<2x1x64xf32>
    %37 = vector.broadcast %36 : vector<2x1x64xf32> to vector<2x16x64xf32>
    %38 = arith.mulf %2, %37 : vector<2x16x64xf32>
    %39 = vector.shape_cast %38 : vector<2x16x64xf32> to vector<32x64xf32>
    %c0_34 = arith.constant 0 : index
    %c0_35 = arith.constant 0 : index
    %40 = vector.load %arg5[%c0_34, %c0_35] : memref<64x8xf32, #tpu.memory_space<vmem>>, vector<64x8xf32>
    %cst_36 = arith.constant dense<0.000000e+00> : vector<32x8xf32>
    %41 = tpu.matmul %39, %40, %cst_36 {dimension_numbers = #tpu.dot_dimension_numbers<[1], [0], [0], [1], [0, 0, 1, 1], [], []>} : vector<32x64xf32>, vector<64x8xf32>, vector<32x8xf32> -> vector<32x8xf32>
    %42 = vector.shape_cast %41 : vector<32x8xf32> to vector<2x16x8xf32>
    %cst_37 = arith.constant dense<0.000000e+00> : vector<2x8x8xf32>
    %43 = tpu.matmul %3, %1, %cst_37 {dimension_numbers = #tpu.dot_dimension_numbers<[2], [1], [1], [2], [0, 0, 0, 1, 1, 2], [0], [0]>} : vector<2x8x16xf32>, vector<2x16x8xf32>, vector<2x8x8xf32> -> vector<2x8x8xf32>
    %cst_38 = arith.constant dense<0.000000e+00> : vector<2x16x8xf32>
    %44 = tpu.matmul %42, %43, %cst_38 {dimension_numbers = #tpu.dot_dimension_numbers<[2], [1], [1], [2], [0, 0, 0, 1, 1, 2], [0], [0]>} : vector<2x16x8xf32>, vector<2x8x8xf32>, vector<2x16x8xf32> -> vector<2x16x8xf32>
    %45 = tpu.concatenate %1, %4, %8, %44 in 2 : vector<2x16x8xf32>, vector<2x16x8xf32>, vector<2x16x8xf32>, vector<2x16x8xf32> -> vector<2x16x32xf32>
    %46 = vector.shape_cast %45 : vector<2x16x32xf32> to vector<32x32xf32>
    %c0_39 = arith.constant 0 : index
    %c0_40 = arith.constant 0 : index
    %47 = vector.load %arg6[%c0_39, %c0_40] : memref<32x8xf32, #tpu.memory_space<vmem>>, vector<32x8xf32>
    %cst_41 = arith.constant dense<0.000000e+00> : vector<32x8xf32>
    %48 = tpu.matmul %46, %47, %cst_41 {dimension_numbers = #tpu.dot_dimension_numbers<[1], [0], [0], [1], [0, 0, 1, 1], [], []>} : vector<32x32xf32>, vector<32x8xf32>, vector<32x8xf32> -> vector<32x8xf32>
    %c0_42 = arith.constant 0 : index
    %c0_43 = arith.constant 0 : index
    %49 = vector.load %arg7[%c0_42, %c0_43] : memref<1x8xf32, #tpu.memory_space<vmem>>, vector<1x8xf32>
    %50 = vector.broadcast %49 : vector<1x8xf32> to vector<32x8xf32>
    %51 = arith.addf %48, %50 : vector<32x8xf32>
    %52 = vector.shape_cast %51 : vector<32x8xf32> to vector<2x16x8xf32>
    %cst_44 = arith.constant dense<0.000000e+00> : vector<2x8xf32>
    %53 = vector.multi_reduction <add>, %52, %cst_44 [1] : vector<2x16x8xf32> to vector<2x8xf32>
    %54 = vector.shape_cast %53 : vector<2x8xf32> to vector<2x1x8xf32>
    %cst_45 = arith.constant 1.600000e+01 : f32
    %55 = vector.broadcast %cst_45 : f32 to vector<2x1x8xf32>
    %56 = arith.divf %54, %55 : vector<2x1x8xf32>
    %57 = vector.broadcast %56 : vector<2x1x8xf32> to vector<2x16x8xf32>
    %58 = arith.subf %52, %57 : vector<2x16x8xf32>
    %59 = arith.mulf %58, %58 : vector<2x16x8xf32>
    %cst_46 = arith.constant dense<0.000000e+00> : vector<2x8xf32>
    %60 = vector.multi_reduction <add>, %59, %cst_46 [1] : vector<2x16x8xf32> to vector<2x8xf32>
    %61 = vector.shape_cast %60 : vector<2x8xf32> to vector<2x1x8xf32>
    %cst_47 = arith.constant 1.600000e+01 : f32
    %62 = vector.broadcast %cst_47 : f32 to vector<2x1x8xf32>
    %63 = arith.divf %61, %62 : vector<2x1x8xf32>
    %64 = vector.broadcast %56 : vector<2x1x8xf32> to vector<2x16x8xf32>
    %65 = arith.subf %52, %64 : vector<2x16x8xf32>
    %cst_48 = arith.constant 9.99999974E-6 : f32
    %66 = vector.broadcast %cst_48 : f32 to vector<2x1x8xf32>
    %67 = arith.addf %63, %66 : vector<2x1x8xf32>
    %68 = math.rsqrt %67 : vector<2x1x8xf32>
    %69 = vector.broadcast %68 : vector<2x1x8xf32> to vector<2x16x8xf32>
    %70 = arith.mulf %65, %69 : vector<2x16x8xf32>
    %c0_49 = arith.constant 0 : index
    %c0_50 = arith.constant 0 : index
    %71 = vector.load %arg8[%c0_49, %c0_50] : memref<1x8xf32, #tpu.memory_space<vmem>>, vector<1x8xf32>
    %72 = vector.shape_cast %71 : vector<1x8xf32> to vector<1x1x8xf32>
    %73 = vector.broadcast %72 : vector<1x1x8xf32> to vector<2x16x8xf32>
    %74 = arith.mulf %70, %73 : vector<2x16x8xf32>
    %c0_51 = arith.constant 0 : index
    %c0_52 = arith.constant 0 : index
    %75 = vector.load %arg9[%c0_51, %c0_52] : memref<1x8xf32, #tpu.memory_space<vmem>>, vector<1x8xf32>
    %76 = vector.shape_cast %75 : vector<1x8xf32> to vector<1x1x8xf32>
    %77 = vector.broadcast %76 : vector<1x1x8xf32> to vector<2x16x8xf32>
    %78 = arith.addf %74, %77 : vector<2x16x8xf32>
    %cst_53 = arith.constant 0.000000e+00 : f32
    %79 = vector.broadcast %cst_53 : f32 to vector<2x16x8xf32>
    %80 = arith.maximumf %78, %79 : vector<2x16x8xf32>
    %81 = arith.addf %1, %80 : vector<2x16x8xf32>
    %c0_54 = arith.constant 0 : index
    %c0_55 = arith.constant 0 : index
    %c0_56 = arith.constant 0 : index
    %82 = vector.load %arg10[%c0_54, %c0_55, %c0_56] : memref<2x16x8xf32, #tpu.memory_space<vmem>>, vector<2x16x8xf32>
    tpu.vector_store %arg10[%c0_54, %c0_55, %c0_56], %81 {strides = array<i32>} : memref<2x16x8xf32, #tpu.memory_space<vmem>>, vector<2x16x8xf32>,
    return
  }
  func.func @transform_0(%arg0: i32) -> (i32, i32, i32) {
    %c0_i32 = arith.constant 0 : i32
    %c0_i32_0 = arith.constant 0 : i32
    %c0_i32_1 = arith.constant 0 : i32
    return %arg0, %c0_i32, %c0_i32_0 : i32, i32, i32
  }
  func.func @transform_1(%arg0: i32) -> (i32, i32, i32) {
    %c0_i32 = arith.constant 0 : i32
    %c0_i32_0 = arith.constant 0 : i32
    %c0_i32_1 = arith.constant 0 : i32
    return %arg0, %c0_i32, %c0_i32_0 : i32, i32, i32
  }
  func.func @transform_2(%arg0: i32) -> (i32, i32, i32) {
    %c0_i32 = arith.constant 0 : i32
    %c0_i32_0 = arith.constant 0 : i32
    %c0_i32_1 = arith.constant 0 : i32
    %c0_i32_2 = arith.constant 0 : i32
    return %c0_i32, %c0_i32_0, %c0_i32_1 : i32, i32, i32
  }
  func.func @transform_3(%arg0: i32) -> (i32, i32, i32) {
    %c0_i32 = arith.constant 0 : i32
    %c0_i32_0 = arith.constant 0 : i32
    %c0_i32_1 = arith.constant 0 : i32
    %c0_i32_2 = arith.constant 0 : i32
    return %c0_i32, %c0_i32_0, %c0_i32_1 : i32, i32, i32
  }
  func.func @transform_4(%arg0: i32) -> (i32, i32) {
    %c0_i32 = arith.constant 0 : i32
    %c0_i32_0 = arith.constant 0 : i32
    %c0_i32_1 = arith.constant 0 : i32
    return %c0_i32, %c0_i32_0 : i32, i32
  }
  func.func @transform_5(%arg0: i32) -> (i32, i32) {
    %c0_i32 = arith.constant 0 : i32
    %c0_i32_0 = arith.constant 0 : i32
    %c0_i32_1 = arith.constant 0 : i32
    return %c0_i32, %c0_i32_0 : i32, i32
  }
  func.func @transform_6(%arg0: i32) -> (i32, i32) {
    %c0_i32 = arith.constant 0 : i32
    %c0_i32_0 = arith.constant 0 : i32
    %c0_i32_1 = arith.constant 0 : i32
    return %c0_i32, %c0_i32_0 : i32, i32
  }
  func.func @transform_7(%arg0: i32) -> (i32, i32) {
    %c0_i32 = arith.constant 0 : i32
    %c0_i32_0 = arith.constant 0 : i32
    %c0_i32_1 = arith.constant 0 : i32
    return %c0_i32, %c0_i32_0 : i32, i32
  }
  func.func @transform_8(%arg0: i32) -> (i32, i32) {
    %c0_i32 = arith.constant 0 : i32
    %c0_i32_0 = arith.constant 0 : i32
    %c0_i32_1 = arith.constant 0 : i32
    return %c0_i32, %c0_i32_0 : i32, i32
  }
  func.func @transform_9(%arg0: i32) -> (i32, i32, i32) {
    %c0_i32 = arith.constant 0 : i32
    %c0_i32_0 = arith.constant 0 : i32
    %c0_i32_1 = arith.constant 0 : i32
    return %arg0, %c0_i32, %c0_i32_0 : i32, i32, i32
  }
}

</mosaic_0001>

<bundles_post_ra>
// kernel: tpu_custom_call.1
= control target key start
LH: loop header
LB: loop body
LE: loop exit
PB: predicated region body
PF: predicated region fallthrough
CT: control target
= control target key end

     0   :  { %14 = vsyncpa [#allocation3], 0  ;;  %s1316_s30 = smov 0   ;;  %s1539_s0 = inlined_call_operand.vmem [shape: f32[4,16,104], index: 0, kind: input, shape index: {}]   ;;  %s1540_s1 = inlined_call_operand.vmem [shape: f32[2,2,64], index: 1, kind: input, shape index: {}]   ;;  %s1541_s2 = inlined_call_operand.hbm [shape: f32[3,64,64], index: 2, kind: input, shape index: {}]   ;;  %s1542_s3 = inlined_call_operand.vmem [shape: f32[3,1,64], index: 3, kind: input, shape index: {}]   ;;  %s1543_s4 = inlined_call_operand.vmem [shape: f32[64,8], index: 4, kind: input, shape index: {}]   ;;  %s1544_s5 = inlined_call_operand.vmem [shape: f32[32,8], index: 5, kind: input, shape index: {}]   ;;  %s1545_s6 = inlined_call_operand.vmem [shape: f32[1,8], index: 6, kind: input, shape index: {}]   ;;  %s1546_s7 = inlined_call_operand.vmem [shape: f32[1,8], index: 7, kind: input, shape index: {}]   ;;  %s1547_s8 = inlined_call_operand.vmem [shape: f32[1,8], index: 8, kind: input, shape index: {}]   ;;  %s1548_s9 = inlined_call_operand.vmem [shape: f32[4,16,8], index: 9, kind: output, shape index: {}]  }
   0x1 LB: > { %s261_s12 = sshll.u32 %s1541_s2, 4  ;;  %s1325_s13 = sadd.s32 4294967295, %s1254_s30   ;;  %s1254_s30 = sphi %s1316_s30, %s20_s30   ;;  %s262_s12 = int_to_ptr.hbm [resolvable:$true] %s261_s12 }
   0x2   : > { %p1131_p0 = scmp.ge.s32.totalorder %s1254_s30, 1  ;;  %p250_p1 = scmp.lt.s32.totalorder %s1254_s30, 3 }
   0x3   : > { %p1182_p2 = scmp.eq.s32.totalorder %s1325_s13, 0  ;;  %s1256_s14 = smov [#allocation2]  }
   0x4   : > { %p251_p3 = pnand %p1131_p0, %p250_p1  ;;  %s263_s15 = sshll.u32 %s1256_s14, 4  ;;  %s264_s15 = int_to_ptr.vmem [resolvable:$true] %s263_s15 }
   0x5   : > { %s1257_s16 = smov 128   ;;  %s1258_s17 = smov 8  }
   0x6   : > { %p1178_p4 = pneg %p251_p3  ;;  %314 = sbr.rel (%p251_p3) target bundleno = 1583 (0x62f), region = 56 }
   0x8   : > { %p1179_p5 = pnand %p1182_p2, %p1178_p4 }
   0xa   : > { %1181 = dma.hbm_to_vmem [thread:$0]  (!%p1179_p5), %s262_s12, 3072, %s264_s15, [#allocation3], %s1257_s16, %s1257_s16, %s1258_s17  }
   0xb   : > { %1249 = dma.done.wait (%p1182_p2), [#allocation3], 3072  }
   0xc   : > { %1251 = vsyncadd (%p1182_p2), [#allocation3], 4294964224  ;;  %s1136_s18 = sshll.u32 %s1325_s13, 1  ;;  %s1259_s23 = smov 112   ;;  %vm387_vm0 = vcmask 130048   ;;  %v512_v6 = vld [vmem:[#allocation2 + $0x38] sm:$0xff] }
   0xd   : > { %p358_p6 = scmp.lt.s32.totalorder %s1136_s18, 3  ;;  %v511_v7 = vld [vmem:[#allocation2 + $0x30] sm:$0xff]  ;;  %p364_p7 = scmp.lt.s32.totalorder %s1325_s13, 1  ;;  %v510_v8 = vld [vmem:[#allocation2 + $0x28] sm:$0xff]  ;;  %v509_v9 = vld [vmem:[#allocation2 + $0x20] sm:$0xff]  ;;  %vm517_vm1 = vcmask 523264  }
   0xe   : > { %v508_v10 = vld [vmem:[#allocation2 + $0x18] sm:$0xff]  ;;  %v507_v11 = vld [vmem:[#allocation2 + $0x10] sm:$0xff]  ;;  %v506_v12 = vld [vmem:[#allocation2 + $0x8] sm:$0xff]  ;;  %s1260_s28 = smov 40   ;;  %s1261_s11 = smov 16   ;;  %vm736_vm2 = vcmask 64512  }
   0xf   : > { %s1550_s18 = smov (!%p358_p6, %s1136_s18), 3  ;;  %s1552_s13 = smov (!%p364_p7, %s1325_s13), 1  ;;  %v505_v13 = vld [vmem:[#allocation2] sm:$0xff]  ;;  %v550_v19 = vld [vmem:[#allocation2 + $0x78] sm:$0xff]  ;;  %v549_v20 = vld [vmem:[#allocation2 + $0x70] sm:$0xff]  ;;  %vm851_vm3 = vcmask 195584  }
  0x10   : > { %s1172_s19 = sshll.u32 %s1550_s18, 4  ;;  %s1139_s24 = sshll.u32 %s1552_s13, 1  ;;  %v548_v21 = vld [vmem:[#allocation2 + $0x68] sm:$0xff]  ;;  %v547_v22 = vld [vmem:[#allocation2 + $0x60] sm:$0xff]  ;;  %v546_v25 = vld [vmem:[#allocation2 + $0x58] sm:$0xff]  ;;  %vm864_vm4 = vcmask 261120  }
  0x11   : > { %s362_s22 = scalar_lea.vmem %s1539_s0, %s1172_s19  ;;  %s367_s27 = scalar_lea.vmem %s1540_s1, %s1139_s24  ;;  %v1202_v23 = vld [vmem:[%s1542_s3] ss:$0 sm:$0xff]  ;;  %v545_v26 = vld [vmem:[#allocation2 + $0x50] sm:$0xff]  ;;  %v544_v28 = vld [vmem:[#allocation2 + $0x48] sm:$0xff] }
  0x12   : > { %v1339_v0 = vld [vmem:[%s362_s22 + $0x8] sm:$0xff]  ;;  %v1343_v1 = vld [vmem:[%s362_s22] sm:$0xff]  ;;  %v1347_v2 = vld [vmem:[%s362_s22 + $0x18] sm:$0xff]  ;;  %s1262_s16 = smov 24   ;;  %s1263_s17 = smov 104  }
  0x13   : > { %383 = vrot.lane.b32.xlu0 %v1339_v0, %s1259_s23  ;;  %419 = vrot.lane.b32.xlu1 %v1347_v2, %s1259_s23  ;;  %v1354_v4 = vld [vmem:[%s362_s22 + $0x10] sm:$0xff]  ;;  %v504_v14 = vld [vmem:[%s367_s27] sm:$0x3]  ;;  %v588_v31 = vld [vmem:[#allocation2 + $0xb8] sm:$0xff]  ;;  %s1264_s20 = smov 8   ;;  %s373_s21 = scalar_lea.vmem %s1548_s9, %s1172_s19 }
  0x14   : > { %v543_v30 = vld [vmem:[#allocation2 + $0x40] sm:$0xff]  ;;  %v587_v32 = vld [vmem:[#allocation2 + $0xb0] sm:$0xff]  ;;  %v586_v33 = vld [vmem:[#allocation2 + $0xa8] sm:$0xff] }
  0x15   : > { %v585_v34 = vld [vmem:[#allocation2 + $0xa0] sm:$0xff]  ;;  %v584_v35 = vld [vmem:[#allocation2 + $0x98] sm:$0xff]  ;;  %v583_v36 = vld [vmem:[#allocation2 + $0x90] sm:$0xff] }
  0x16   : > { %v582_v37 = vld [vmem:[#allocation2 + $0x88] sm:$0xff]  ;;  %v581_v38 = vld [vmem:[#allocation2 + $0x80] sm:$0xff] }
  0x17   : > { %v1203_v49 = vld [vmem:[%s1542_s3 + $0x1] ss:$0 sm:$0xff]  ;;  %v1204_v59 = vld [vmem:[%s1542_s3 + $0x2] ss:$0 sm:$0xff] }
  0x1b   : > { %381 = vrot.lane.b32.xlu0 %v1343_v1, %s1259_s23  ;;  %417 = vrot.lane.b32.xlu1 %v1354_v4, %s1259_s23 }
  0x23   : > { %688 = vrot.lane.b32.xlu1 %v1343_v1, %s1260_s28 }
  0x2b   : > { %712 = vrot.lane.b32.xlu1 %v1354_v4, %s1260_s28 }
  0x85   : > { %v1351_v3 = vpop.permute.xlu0 %383  ;;  %v1375_v15 = vpop.permute.xlu1 %419 }
  0x86   : > { %406 = vmatpush.msra.mxu0 %v1351_v3  ;;  %441 = vmatpush.msra.mxu1 %v1375_v15 }
  0x8d   : > { %v1358_v5 = vpop.permute.xlu0 %381  ;;  %v1380_v17 = vpop.permute.xlu1 %417 }
  0x8e   : > { %407 = vmatpush.msra.mxu0 %v1358_v5  ;;  %442 = vmatpush.msra.mxu1 %v1380_v17 }
  0x8f   : > { %1143 = vmatmul.msk.f32.vlgmr.msra.gmra.mxu0 %vm387_vm0, %v1343_v1  ;;  %1145 = vmatmul.msk.f32.vlgmr.msra.gmra.mxu1 %vm387_vm0, %v1354_v4 }
  0x90   : > { %529 = vmatpush.msrb.mxu0 %v512_v6  ;;  %730 = vmatpush.msrb.mxu1 %v1375_v15 }
  0x92   : > { %530 = vmatpush.msrb.mxu0 %v511_v7  ;;  %731 = vmatpush.msrb.mxu1 %v1380_v17 }
  0x94   : > { %531 = vmatpush.msrb.mxu0 %v510_v8 }
  0x95   : > { %v689_v40 = vpop.permute.xlu1 %688 }
  0x96   : > { %532 = vmatpush.msrb.mxu0 %v509_v9 }
  0x97   : > { %1144 = vmatmul.msk.f32.gmra.mxu0 %vm387_vm0, %v1339_v0  ;;  %1146 = vmatmul.msk.f32.gmra.mxu1 %vm387_vm0, %v1347_v2 }
  0x98   : > { %533 = vmatpush.msrb.mxu0 %v508_v10 }
  0x9a   : > { %534 = vmatpush.msrb.mxu0 %v507_v11 }
  0x9c   : > { %535 = vmatpush.msrb.mxu0 %v506_v12 }
  0x9d   : > { %v713_v42 = vpop.permute.xlu1 %712 }
  0x9e   : > { %536 = vmatpush.msrb.mxu0 %v505_v13  ;;  %v638_v13 = vld [vmem:[%s1543_s4 + $0x38] sm:$0xff] }
  0x9f   : > { %1151 = vmatmul.msk.f32.vlgmr.msrb.gmra.mxu0 %vm517_vm1, %v504_v14  ;;  %1161 = vmatmul.msk.f32.vlgmr.msrb.gmra.mxu1 %vm387_vm0, %v713_v42  ;;  %v637_v14 = vld [vmem:[%s1543_s4 + $0x30] sm:$0xff] }
  0xa0   : > { %706 = vmatpush.msra.mxu0 %v1351_v3 }
  0xa2   : > { %707 = vmatpush.msra.mxu0 %v1358_v5 }
  0xa7   : > { %1160 = vmatmul.msk.f32.vlgmr.msra.gmra.mxu0 %vm387_vm0, %v689_v40 }
 0x10c   : > { %v1378_v16 = vpop.f32.mrf.mxu0  ;;  %v444_v39 = vpop.f32.mrf.mxu1 }
 0x114   : > { %v1386_v18 = vpop.f32.mrf.mxu0  ;;  %v447_v41 = vpop.f32.mrf.mxu1 }
 0x115   : > { %464 = vmatpush.msra.mxu2 %v1386_v18  ;;  %487 = vmatpush.msra.mxu3 %v447_v41 }
 0x117   : > { %465 = vmatpush.msra.mxu2 %v1378_v16  ;;  %488 = vmatpush.msra.mxu3 %v444_v39 }
 0x118   : > { %1147 = vmatmul.msk.f32.vlgmr.msra.gmra.mxu2 %vm387_vm0, %v1343_v1  ;;  %1149 = vmatmul.msk.f32.vlgmr.msra.gmra.mxu3 %vm387_vm0, %v1354_v4 }
 0x119   : > { %567 = vmatpush.msrb.mxu2 %v550_v19  ;;  %667 = vmatpush.msrb.mxu3 %v638_v13  ;;  %v636_v19 = vld [vmem:[%s1543_s4 + $0x28] sm:$0xff] }
 0x11b   : > { %568 = vmatpush.msrb.mxu2 %v549_v20  ;;  %668 = vmatpush.msrb.mxu3 %v637_v14  ;;  %v633_v20 = vld [vmem:[%s1543_s4 + $0x10] sm:$0xff] }
 0x11c   : > { %v538_v24 = vpop.f32.mrf.mxu0 }
 0x11d   : > { %569 = vmatpush.msrb.mxu2 %v548_v21  ;;  %v539_v27 = vadd.f32 %v1202_v23, %v538_v24  ;;  %669 = vmatpush.msrb.mxu3 %v636_v19  ;;  %v632_v21 = vld [vmem:[%s1543_s4 + $0x8] sm:$0xff] }
 0x11f   : > { %570 = vmatpush.msrb.mxu2 %v547_v22  ;;  %v541_v29 = vmax.f32 %v539_v27, 0.0  ;;  %v631_v22 = vld [vmem:[%s1543_s4] sm:$0xff] }
 0x120   : > { %1148 = vmatmul.msk.f32.gmra.mxu2 %vm387_vm0, %v1339_v0  ;;  %1150 = vmatmul.msk.f32.gmra.mxu3 %vm387_vm0, %v1347_v2 }
 0x121   : > { %571 = vmatpush.msrb.mxu2 %v546_v25 }
 0x123   : > { %572 = vmatpush.msrb.mxu2 %v545_v26 }
 0x124   : > { %v709_v25 = vpop.f32.mrf.mxu0 }
 0x125   : > { %573 = vmatpush.msrb.mxu2 %v544_v28  ;;  %v733_v28 = vpop.f32.mrf.mxu1 }
 0x126   : > { %787 = vmatpush.msrb.mxu0 %v733_v28 }
 0x127   : > { %574 = vmatpush.msrb.mxu2 %v543_v30 }
 0x128   : > { %1153 = vmatmul.msk.f32.vlgmr.msrb.gmra.mxu2 %vm517_vm1, %v541_v29 }
 0x129   : > { %605 = vmatpush.msra.mxu2 %v588_v31 }
 0x12b   : > { %606 = vmatpush.msra.mxu2 %v587_v32 }
 0x12d   : > { %607 = vmatpush.msra.mxu2 %v586_v33  ;;  %v859_v33 = vld [vmem:[%s1544_s5 + $0x18] sm:$0xff] }
 0x12e   : > { %889 = vmatpush.msra.mxu1 %v859_v33 }
 0x12f   : > { %608 = vmatpush.msra.mxu2 %v585_v34  ;;  %v858_v34 = vld [vmem:[%s1544_s5 + $0x10] sm:$0xff] }
 0x130   : > { %890 = vmatpush.msra.mxu1 %v858_v34 }
 0x131   : > { %609 = vmatpush.msra.mxu2 %v584_v35  ;;  %v857_v35 = vld [vmem:[%s1544_s5 + $0x8] sm:$0xff] }
 0x132   : > { %891 = vmatpush.msra.mxu1 %v857_v35 }
 0x133   : > { %610 = vmatpush.msra.mxu2 %v583_v36  ;;  %v856_v36 = vld [vmem:[%s1544_s5] sm:$0xff] }
 0x134   : > { %892 = vmatpush.msra.mxu1 %v856_v36 }
 0x135   : > { %611 = vmatpush.msra.mxu2 %v582_v37 }
 0x137   : > { %612 = vmatpush.msra.mxu2 %v581_v38 }
 0x139   : > { %758 = vmatpush.msrb.mxu2 %v709_v25 }
 0x19b   : > { %v467_v43 = vpop.f32.mrf.mxu2  ;;  %v490_v53 = vpop.f32.mrf.mxu3 }
 0x19c   : > { %v496_v44 = vmul.f32 2.0, %v467_v43  ;;  %v498_v54 = vmul.f32 2.0, %v490_v53 }
 0x19e   : > { %v500_v45 = vsub.f32 %v496_v44, %v1358_v5  ;;  %v502_v55 = vsub.f32 %v498_v54, %v1380_v17 }
 0x1a0   : > { %815 = vrot.lane.b32.xlu1 %v500_v45, %s1261_s11 }
 0x1a3   : > { %v470_v46 = vpop.f32.mrf.mxu2  ;;  %v493_v56 = vpop.f32.mrf.mxu3 }
 0x1a4   : > { %v497_v47 = vmul.f32 2.0, %v470_v46  ;;  %v499_v57 = vmul.f32 2.0, %v493_v56 }
 0x1a6   : > { %v501_v48 = vsub.f32 %v497_v47, %v1351_v3  ;;  %v503_v58 = vsub.f32 %v499_v57, %v1375_v15 }
 0x1a8   : > { %817 = vrot.lane.b32.xlu1 %v501_v48, %s1261_s11 }
 0x1ab   : > { %v576_v50 = vpop.f32.mrf.mxu2 }
 0x1ac   : > { %v577_v51 = vadd.f32 %v1203_v49, %v576_v50 }
 0x1ae   : > { %v579_v52 = vmax.f32 %v577_v51, 0.0 }
 0x1b0   : > { %1155 = vmatmul.msk.f32.vlgmr.msra.gmra.mxu2 %vm517_vm1, %v579_v52  ;;  %819 = vrot.lane.b32.xlu1 %v502_v55, %s1261_s11 }
 0x1b8   : > { %821 = vrot.lane.b32.xlu1 %v503_v58, %s1261_s11 }
 0x212   : > { %v816_v42 = vpop.permute.xlu1 %815 }
 0x21a   : > { %v818_v48 = vpop.permute.xlu1 %817 }
 0x222   : > { %v820_v53 = vpop.permute.xlu1 %819 }
 0x233   : > { %v614_v60 = vpop.f32.mrf.mxu2 }
 0x234   : > { %v615_v61 = vadd.f32 %v1204_v59, %v614_v60  ;;  %v822_v59 = vpop.permute.xlu1 %821 }
 0x236   : > { %v619_v62 = vperm.slane %v615_v61, 0  ;;  %v618_v63 = vrot.slane %v615_v61, 1 }
 0x238   : > { %621 = vrot.lane.b32.xlu2 %v619_v62, %s1262_s16  ;;  %v620_v6 = vperm.slane %v618_v63, 0 }
 0x240   : > { %623 = vrot.lane.b32.xlu2 %v620_v6, %s1262_s16  ;;  %v1205_v6 = vld [vmem:[%s1545_s6] ss:$0 sm:$0xff] }
 0x292   : > { %v622_v7 = vpop.permute.xlu2 %621 }
 0x293   : > { %v627_v8 = vmul.f32 %v622_v7, %v1343_v1  ;;  %v628_v9 = vmul.f32 %v622_v7, %v1339_v0 }
 0x295   : > { %643 = vrot.lane.b32.xlu0 %v627_v8, %s1263_s17  ;;  %645 = vrot.lane.b32.xlu2 %v628_v9, %s1263_s17 }
 0x29a   : > { %v624_v10 = vpop.permute.xlu2 %623 }
 0x29b   : > { %v629_v11 = vmul.f32 %v624_v10, %v1354_v4  ;;  %v630_v12 = vmul.f32 %v624_v10, %v1347_v2 }
 0x29d   : > { %649 = vrot.lane.b32.xlu2 %v630_v12, %s1263_s17  ;;  %647 = vrot.lane.b32.xlu0 %v629_v11, %s1263_s17 }
 0x2a5   : > { %799 = vrot.lane.b32.xlu0 %v1378_v16, %s1264_s20  ;;  %v635_v16 = vld [vmem:[%s1543_s4 + $0x20] sm:$0xff] }
 0x2a6   : > { %670 = vmatpush.msrb.mxu3 %v635_v16 }
 0x2ad   : > { %801 = vrot.lane.b32.xlu0 %v1386_v18, %s1264_s20  ;;  %v634_v18 = vld [vmem:[%s1543_s4 + $0x18] sm:$0xff] }
 0x2ae   : > { %671 = vmatpush.msrb.mxu3 %v634_v18 }
 0x2b0   : > { %672 = vmatpush.msrb.mxu3 %v633_v20 }
 0x2b2   : > { %673 = vmatpush.msrb.mxu3 %v632_v21 }
 0x2b4   : > { %674 = vmatpush.msrb.mxu3 %v631_v22 }
 0x2b5   : > { %803 = vrot.lane.b32.xlu0 %v444_v39, %s1264_s20 }
 0x2bd   : > { %805 = vrot.lane.b32.xlu0 %v447_v41, %s1264_s20 }
 0x2ef   : > { %v646_v24 = vpop.permute.xlu2 %645 }
 0x2f7   : > { %v650_v27 = vpop.permute.xlu2 %649 }
 0x307   : > { %v644_v23 = vpop.permute.xlu0 %643 }
 0x308   : > { %1156 = vmatmul.msk.f32.vlgmr.msrb.gmra.mxu3 %vm517_vm1, %v644_v23 }
 0x30f   : > { %v648_v26 = vpop.permute.xlu0 %647 }
 0x310   : > { %1157 = vmatmul.msk.f32.gmra.mxu3 %vm517_vm1, %v646_v24 }
 0x317   : > { %v800_v41 = vpop.permute.xlu0 %799 }
 0x318   : > { %1158 = vmatmul.msk.f32.gmra.mxu3 %vm517_vm1, %v648_v26  ;;  %v843_v43 = vsel %vm736_vm2, %v1358_v5, %v800_v41 }
 0x319   : > { %v847_v45 = vsel %vm387_vm0, %v843_v43, %v816_v42 }
 0x31f   : > { %v802_v44 = vpop.permute.xlu0 %801 }
 0x320   : > { %1159 = vmatmul.msk.f32.gmra.mxu3 %vm517_vm1, %v650_v27  ;;  %v844_v49 = vsel %vm736_vm2, %v1351_v3, %v802_v44 }
 0x321   : > { %v848_v52 = vsel %vm387_vm0, %v844_v49, %v818_v48 }
 0x327   : > { %v804_v50 = vpop.permute.xlu0 %803 }
 0x328   : > { %v845_v54 = vsel %vm736_vm2, %v1380_v17, %v804_v50  ;;  %v1265_v17 = vmov 16.0  }
 0x329   : > { %v849_v56 = vsel %vm387_vm0, %v845_v54, %v820_v53  ;;  %1208 = vrcp.f32 %v1265_v17 }
 0x32f   : > { %v806_v58 = vpop.permute.xlu0 %805  ;;  %v1209_v7 = vpop.eup %1208 }
 0x330   : > { %v846_v3 = vsel %vm736_vm2, %v1375_v15, %v806_v58  ;;  %v925_v9 = vmul.f32 16.0, %v1209_v7  ;;  %vm929_vm5 = vweird.f32 %v1209_v7 }
 0x331   : > { %v850_v61 = vsel %vm387_vm0, %v846_v3, %v822_v59 }
 0x332   : > { %v926_v13 = vsub.f32 1.0, %v925_v9 }
 0x334   : > { %v927_v16 = vmul.f32 %v1209_v7, %v926_v13 }
 0x336   : > { %v928_v22 = vadd.f32 %v1209_v7, %v927_v16 }
 0x338   : > { %v930_v25 = vsel %vm929_vm5, %v1209_v7, %v928_v22 }
 0x38b   : > { %v676_v29 = vpop.f32.mrf.mxu3 }
 0x38c   : > { %1162 = vmatmul.msk.f32.vlgmr.msrb.gmra.mxu2 %vm736_vm2, %v676_v29 }
 0x393   : > { %v679_v30 = vpop.f32.mrf.mxu3 }
 0x394   : > { %1163 = vmatmul.msk.f32.gmra.mxu2 %vm736_vm2, %v679_v30 }
 0x39b   : > { %v682_v31 = vpop.f32.mrf.mxu3 }
 0x39c   : > { %1164 = vmatmul.msk.f32.vlgmr.msrb.gmra.mxu0 %vm736_vm2, %v682_v31 }
 0x3a3   : > { %v685_v32 = vpop.f32.mrf.mxu3 }
 0x3a4   : > { %1165 = vmatmul.msk.f32.gmra.mxu0 %vm736_vm2, %v685_v32 }
 0x40f   : > { %v760_v37 = vpop.f32.mrf.mxu2 }
 0x410   : > { %831 = vrot.lane.b32.xlu2 %v760_v37, %s1262_s16 }
 0x417   : > { %v763_v38 = vpop.f32.mrf.mxu2 }
 0x418   : > { %833 = vrot.lane.b32.xlu2 %v763_v38, %s1262_s16 }
 0x419   : > { %v789_v39 = vpop.f32.mrf.mxu0 }
 0x420   : > { %835 = vrot.lane.b32.xlu2 %v789_v39, %s1262_s16 }
 0x421   : > { %v792_v40 = vpop.f32.mrf.mxu0 }
 0x428   : > { %837 = vrot.lane.b32.xlu2 %v792_v40, %s1262_s16 }
 0x46a   : > { %v832_v46 = vpop.permute.xlu2 %831 }
 0x46b   : > { %v852_v47 = vsel %vm851_vm3, %v847_v45, %v832_v46 }
 0x46c   : > { %1166 = vmatmul.msk.f32.vlgmr.msra.gmra.mxu1 %vm864_vm4, %v852_v47 }
 0x472   : > { %v834_v51 = vpop.permute.xlu2 %833 }
 0x473   : > { %v853_v5 = vsel %vm851_vm3, %v848_v52, %v834_v51 }
 0x474   : > { %1167 = vmatmul.msk.f32.gmra.mxu1 %vm864_vm4, %v853_v5 }
 0x47a   : > { %v836_v55 = vpop.permute.xlu2 %835 }
 0x47b   : > { %v854_v57 = vsel %vm851_vm3, %v849_v56, %v836_v55 }
 0x47c   : > { %1168 = vmatmul.msk.f32.gmra.mxu1 %vm864_vm4, %v854_v57 }
 0x482   : > { %v838_v60 = vpop.permute.xlu2 %837 }
 0x483   : > { %v855_v62 = vsel %vm851_vm3, %v850_v61, %v838_v60 }
 0x484   : > { %1169 = vmatmul.msk.f32.gmra.mxu1 %vm864_vm4, %v855_v62 }
 0x4e9   : > { %v894_v63 = vpop.f32.mrf.mxu1 }
 0x4ea   : > { %v895_v8 = vadd.f32 %v1205_v6, %v894_v63 }
 0x4ec   : > { %v906_v11 = vsel %vm736_vm2, %v895_v8, 0.0 }
 0x4f1   : > { %v897_v10 = vpop.f32.mrf.mxu1 }
 0x4f2   : > { %v898_v15 = vadd.f32 %v1205_v6, %v897_v10 }
 0x4f4   : > { %v907_v12 = vsel %vm736_vm2, %v898_v15, 0.0 }
 0x4f5   : > { %v908_v14 = vadd.f32 %v907_v12, %v906_v11 }
 0x4f7   : > { %v909_v19 = vrot.slane %v908_v14, 4 }
 0x4f9   : > { %v910_v18 = vadd.f32 %v909_v19, %v908_v14  ;;  %v900_v20 = vpop.f32.mrf.mxu1  ;;  %v1206_v19 = vld [vmem:[%s1546_s7] ss:$0 sm:$0xff] }
 0x4fa   : > { %v901_v26 = vadd.f32 %v1205_v6, %v900_v20 }
 0x4fb   : > { %v911_v21 = vrot.slane %v910_v18, 2 }
 0x4fc   : > { %v915_v31 = vsel %vm736_vm2, %v901_v26, 0.0 }
 0x4fd   : > { %v912_v23 = vadd.f32 %v911_v21, %v910_v18  ;;  %v1207_v21 = vld [vmem:[%s1547_s8] ss:$0 sm:$0xff] }
 0x4ff   : > { %v913_v24 = vrot.slane %v912_v23, 1 }
 0x501   : > { %v914_v27 = vadd.f32 %v913_v24, %v912_v23  ;;  %v903_v28 = vpop.f32.mrf.mxu1 }
 0x502   : > { %v904_v29 = vadd.f32 %v1205_v6, %v903_v28 }
 0x503   : > { %v931_v30 = vmul.f32 %v930_v25, %v914_v27 }
 0x504   : > { %v916_v32 = vsel %vm736_vm2, %v904_v29, 0.0 }
 0x505   : > { %v933_v33 = vsub.f32 %v895_v8, %v931_v30  ;;  %v934_v34 = vsub.f32 %v898_v15, %v931_v30  ;;  %v917_v35 = vadd.f32 %v916_v32, %v915_v31 }
 0x507   : > { %v937_v36 = vmul.f32 %v933_v33, %v933_v33  ;;  %v938_v37 = vmul.f32 %v934_v34, %v934_v34  ;;  %v918_v38 = vrot.slane %v917_v35, 4 }
 0x509   : > { %v941_v39 = vsel %vm736_vm2, %v937_v36, 0.0  ;;  %v942_v40 = vsel %vm736_vm2, %v938_v37, 0.0  ;;  %v919_v41 = vadd.f32 %v918_v38, %v917_v35 }
 0x50a   : > { %v943_v42 = vadd.f32 %v942_v40, %v941_v39 }
 0x50b   : > { %v920_v43 = vrot.slane %v919_v41, 2 }
 0x50c   : > { %v944_v44 = vrot.slane %v943_v42, 4 }
 0x50d   : > { %v921_v45 = vadd.f32 %v920_v43, %v919_v41 }
 0x50e   : > { %v945_v46 = vadd.f32 %v944_v44, %v943_v42 }
 0x50f   : > { %v922_v47 = vrot.slane %v921_v45, 1 }
 0x510   : > { %v946_v48 = vrot.slane %v945_v46, 2 }
 0x511   : > { %v923_v49 = vadd.f32 %v922_v47, %v921_v45 }
 0x512   : > { %v947_v50 = vadd.f32 %v946_v48, %v945_v46 }
 0x513   : > { %v932_v51 = vmul.f32 %v930_v25, %v923_v49 }
 0x514   : > { %v948_v52 = vrot.slane %v947_v50, 1 }
 0x515   : > { %v935_v5 = vsub.f32 %v901_v26, %v932_v51  ;;  %v936_v53 = vsub.f32 %v904_v29, %v932_v51 }
 0x516   : > { %v949_v54 = vadd.f32 %v948_v52, %v947_v50 }
 0x517   : > { %v939_v55 = vmul.f32 %v935_v5, %v935_v5  ;;  %v940_v56 = vmul.f32 %v936_v53, %v936_v53 }
 0x518   : > { %v959_v57 = vmul.f32 %v949_v54, %v930_v25 }
 0x519   : > { %v950_v58 = vsel %vm736_vm2, %v939_v55, 0.0  ;;  %v951_v3 = vsel %vm736_vm2, %v940_v56, 0.0 }
 0x51a   : > { %v961_v59 = vadd.f32 1e-05, %v959_v57  ;;  %v952_v60 = vadd.f32 %v951_v3, %v950_v58 }
 0x51c   : > { %1210 = vrsqrt.f32 %v961_v59  ;;  %v953_v61 = vrot.slane %v952_v60, 4  ;;  %vm969_vm7 = vweird.f32 %v961_v59 }
 0x51e   : > { %v954_v62 = vadd.f32 %v953_v61, %v952_v60 }
 0x520   : > { %v955_v17 = vrot.slane %v954_v62, 2 }
 0x522   : > { %v1211_v63 = vpop.eup %1210  ;;  %v956_v6 = vadd.f32 %v955_v17, %v954_v62 }
 0x523   : > { %v964_v7 = vmul.f32 %v1211_v63, %v961_v59  ;;  %vm970_vm6 = vweird.f32 %v1211_v63 }
 0x524   : > { %v957_v8 = vrot.slane %v956_v6, 1  ;;  %vm971_vm8 = vmor %vm969_vm7, %vm970_vm6 }
 0x525   : > { %v965_v9 = vmul.f32 %v1211_v63, %v964_v7 }
 0x526   : > { %v958_v10 = vadd.f32 %v957_v8, %v956_v6 }
 0x527   : > { %v966_v15 = vmul.f32 0.5, %v965_v9 }
 0x528   : > { %v960_v11 = vmul.f32 %v958_v10, %v930_v25 }
 0x529   : > { %v967_v12 = vsub.f32 1.5, %v966_v15 }
 0x52a   : > { %v962_v13 = vadd.f32 1e-05, %v960_v11 }
 0x52b   : > { %v968_v14 = vmul.f32 %v1211_v63, %v967_v12 }
 0x52c   : > { %1212 = vrsqrt.f32 %v962_v13  ;;  %vm979_vm10 = vweird.f32 %v962_v13 }
 0x52d   : > { %v972_v16 = vsel %vm971_vm8, %v1211_v63, %v968_v14 }
 0x52e   : > { %v983_v18 = vmul.f32 %v972_v16, %v933_v33  ;;  %v984_v20 = vmul.f32 %v972_v16, %v934_v34 }
 0x530   : > { %v992_v22 = vmul.f32 %v1206_v19, %v984_v20  ;;  %v991_v23 = vmul.f32 %v1206_v19, %v983_v18 }
 0x532   : > { %v1213_v24 = vpop.eup %1212  ;;  %v1000_v25 = vadd.f32 %v1207_v21, %v992_v22  ;;  %v999_v26 = vadd.f32 %v1207_v21, %v991_v23 }
 0x533   : > { %v974_v27 = vmul.f32 %v1213_v24, %v962_v13  ;;  %vm980_vm9 = vweird.f32 %v1213_v24 }
 0x534   : > { %v1004_v28 = vmax.f32 %v1000_v25, 0.0  ;;  %v1003_v29 = vmax.f32 %v999_v26, 0.0  ;;  %vm981_vm11 = vmor %vm979_vm10, %vm980_vm9 }
 0x535   : > { %v975_v30 = vmul.f32 %v1213_v24, %v974_v27 }
 0x536   : > { %1013 = vrot.lane.b32.xlu1 %v1004_v28, %s1261_s11  ;;  %1011 = vrot.lane.b32.xlu0 %v1003_v29, %s1261_s11 }
 0x537   : > { %v976_v31 = vmul.f32 0.5, %v975_v30 }
 0x539   : > { %v977_v32 = vsub.f32 1.5, %v976_v31 }
 0x53b   : > { %v978_v33 = vmul.f32 %v1213_v24, %v977_v32 }
 0x53d   : > { %v982_v34 = vsel %vm981_vm11, %v1213_v24, %v978_v33 }
 0x53e   : > { %v985_v35 = vmul.f32 %v982_v34, %v935_v5  ;;  %v986_v36 = vmul.f32 %v982_v34, %v936_v53 }
 0x540   : > { %v994_v37 = vmul.f32 %v1206_v19, %v986_v36  ;;  %v993_v38 = vmul.f32 %v1206_v19, %v985_v35 }
 0x542   : > { %v1002_v39 = vadd.f32 %v1207_v21, %v994_v37  ;;  %v1001_v40 = vadd.f32 %v1207_v21, %v993_v38 }
 0x544   : > { %v1006_v41 = vmax.f32 %v1002_v39, 0.0  ;;  %v1005_v42 = vmax.f32 %v1001_v40, 0.0 }
 0x546   : > { %1017 = vrot.lane.b32.xlu0 %v1006_v41, %s1261_s11  ;;  %1015 = vrot.lane.b32.xlu2 %v1005_v42, %s1261_s11 }
 0x5a0   : > { %v1016_v43 = vpop.permute.xlu2 %1015 }
 0x5a1   : > { %v1025_v44 = vadd.f32 %v1016_v43, %v1354_v4 }
 0x5a3   : > { %1035 = vrot.lane.b32.xlu0 %v1025_v44, %s1259_s23 }
 0x5a8   : > { %v1012_v45 = vpop.permute.xlu0 %1011  ;;  %v1014_v46 = vpop.permute.xlu1 %1013 }
 0x5a9   : > { %v1023_v47 = vadd.f32 %v1012_v45, %v1343_v1  ;;  %v1024_v48 = vadd.f32 %v1014_v46, %v1339_v0 }
 0x5ab   : > { %1031 = vrot.lane.b32.xlu1 %v1023_v47, %s1259_s23  ;;  %1033 = vrot.lane.b32.xlu2 %v1024_v48, %s1259_s23 }
 0x5b8   : > { %v1018_v49 = vpop.permute.xlu0 %1017 }
 0x5b9   : > { %v1026_v50 = vadd.f32 %v1018_v49, %v1347_v2 }
 0x5bb   : > { %1037 = vrot.lane.b32.xlu1 %v1026_v50, %s1259_s23 }
 0x605   : > { %v1034_v4 = vpop.permute.xlu2 %1033 }
 0x606   : > { %1044 = vst.msk [vmem:[%s373_s21 + $0x8] sm:$0xff] %vm736_vm2, %v1034_v4 }
 0x615   : > { %v1036_v51 = vpop.permute.xlu0 %1035 }
 0x616   : > { %1045 = vst.msk [vmem:[%s373_s21 + $0x10] sm:$0xff] %vm736_vm2, %v1036_v51 }
 0x61d   : > { %v1032_v1 = vpop.permute.xlu1 %1031 }
 0x61e   : > { %1043 = vst.msk [vmem:[%s373_s21] sm:$0xff] %vm736_vm2, %v1032_v1 }
 0x62d   : > { %v1038_v0 = vpop.permute.xlu1 %1037 }
 0x62e   : > { %1046 = vst.msk [vmem:[%s373_s21 + $0x18] sm:$0xff] %vm736_vm2, %v1038_v0 }
 0x62f PF: > { %s20_s30 = sadd.s32 1, %s1254_s30  }
 0x630   : > { %p17_p8 = scmp.ge.s32.totalorder %s20_s30, 4  }
 0x632   :  { %19 = sbr.rel (!%p17_p8) target bundleno = 1 (0x1), region = 98 }
 0x637   :  { %1071 = vsyncpa [#allocation3], 1 }
 0x638   :  { %1073 = vsyncpa [#allocation3 + $0x1], 1 }

</bundles_post_ra>
